<compile_context>
chip_gen: v6e
topology: v6e:2x2x1
jax: 0.10.0
libtpu: 0.0.40
codegen_flags: <defaults>
</compile_context>

<pallas_src>
import math

import jax
import jax.numpy as jnp
from jax.experimental import pallas as pl
from jax.experimental.pallas import tpu as pltpu


_MIN_LANES = 128            # below this, masked stores + call overhead dominate
_MAX_TINY_LANE_WIDTH = 2048 # cap for the lane-dense reshape of tiny-D inputs


def _tile_budget_bytes():
    """Per-tile byte budget, generation-aware.

    ~4 MiB on v6e/v7x (fast HBM makes per-step overhead relatively expensive;
    double-buffered in+out <= 16 MiB fits the 32 MiB scoped-VMEM default),
    ~2 MiB on v5e / unknown (16 MiB scoped default).
    """
    try:
        kind = jax.devices()[0].device_kind.lower()
    except Exception:  # pragma: no cover - defensive
        return 2 << 20
    if ("v6" in kind) or ("v7" in kind) or ("7x" in kind):
        return 4 << 20
    return 2 << 20


def _sublane_multiple(*dtypes):
    """Dtype-aware sublane multiple: 8 for 4-byte, 16 for 2-byte, 32 for 1-byte."""
    min_itemsize = min(jnp.dtype(d).itemsize for d in dtypes)
    return max(8, 32 // max(min_itemsize, 1))


# ----------------------------- kernels ------------------------------------- #

def _addbias2d_kernel(x_ref, b_ref, o_ref):
    # x_ref: (TB, TD) at native dtype, b_ref: (1, TD) at bias dtype.
    # Cast in-kernel (free VPU slot) so mixed-dtype inputs never need an XLA
    # pre-cast that would materialize an extra full-tensor copy in HBM.
    o_ref[...] = x_ref[...].astype(o_ref.dtype) + b_ref[...].astype(o_ref.dtype)


def _addbias4d_kernel(x_ref, b_ref, o_ref):
    # x_ref: (TB, TC, THW), b_ref: (TC, 1) -> per-channel bias broadcast over
    # the HW lanes.  The tiny lane-broadcast is VPU/XLU work fully hidden under
    # the x DMA stream for this mem-bound op.
    o_ref[...] = (x_ref[...].astype(o_ref.dtype)
                  + b_ref[...].astype(o_ref.dtype)[None, :, :])


# ----------------------------- pallas wrappers ------------------------------ #

def _add_bias_2d_pallas(x, b_row, out_dtype, donate=False):
    B, D = x.shape
    assert b_row.shape == (1, D)

    x_item = jnp.dtype(x.dtype).itemsize
    out_item = jnp.dtype(out_dtype).itemsize
    b_item = jnp.dtype(b_row.dtype).itemsize
    sub = _sublane_multiple(x.dtype, out_dtype)
    max_elems = max(_tile_budget_bytes() // max(x_item, out_item), 8 * 128)

    if D * sub <= max_elems:
        # Preferred: full-feature-dim block -> contiguous row DMAs, 1-D grid.
        td = D
        tb = min(B, max_elems // D)
        if tb < B:
            tb = max((tb // sub) * sub, sub)
    else:
        # Huge D: tile the feature dim, keep a sublane-multiple of rows.
        tb = B if B < sub else sub
        td = max((max_elems // max(tb, 1) // 128) * 128, 128)

    cost = pl.CostEstimate(
        flops=B * D,
        transcendentals=0,
        bytes_accessed=x.size * x_item + B * D * out_item + b_row.size * b_item,
    )
    alias = {0: 0} if (donate and jnp.dtype(x.dtype) == jnp.dtype(out_dtype)) else {}

    if td == D:
        grid = (pl.cdiv(B, tb),)
        in_specs = [
            pl.BlockSpec((tb, D), lambda i: (i, 0)),
            pl.BlockSpec((1, D), lambda i: (0, 0)),   # bias resident in VMEM
        ]
        out_spec = pl.BlockSpec((tb, D), lambda i: (i, 0))
        sem = ("parallel",)
    else:
        # Feature axis OUTER, batch INNER: the bias block index only changes on
        # the outer axis, so it is re-fetched once per feature tile, not per step.
        grid = (pl.cdiv(D, td), pl.cdiv(B, tb))
        in_specs = [
            pl.BlockSpec((tb, td), lambda j, i: (i, j)),
            pl.BlockSpec((1, td), lambda j, i: (0, j)),
        ]
        out_spec = pl.BlockSpec((tb, td), lambda j, i: (i, j))
        sem = ("parallel", "parallel")

    return pl.pallas_call(
        _addbias2d_kernel,
        out_shape=jax.ShapeDtypeStruct((B, D), out_dtype),
        grid_spec=pltpu.PrefetchScalarGridSpec(
            num_scalar_prefetch=0,
            grid=grid,
            in_specs=in_specs,
            out_specs=out_spec,
        ),
        compiler_params=pltpu.CompilerParams(dimension_semantics=sem),
        cost_estimate=cost,
        input_output_aliases=alias,
    )(x, b_row)


def _add_bias_4d_pallas(x, b_col, out_dtype, donate=False):
    B, C, H, W = x.shape
    HW = H * W
    x3 = x.reshape(B, C, HW)                       # free, contiguous reshape

    x_item = jnp.dtype(x.dtype).itemsize
    out_item = jnp.dtype(out_dtype).itemsize
    b_item = jnp.dtype(b_col.dtype).itemsize
    sub = _sublane_multiple(x.dtype, out_dtype)
    max_elems = max(_tile_budget_bytes() // max(x_item, out_item), 8 * 128)

    if C * HW <= max_elems:
        # Fold batch into the block: one contiguous DMA per (tb, C, HW) slab.
        tc, thw = C, HW
        tb = max(1, min(B, max_elems // (C * HW)))
    elif HW * sub <= max_elems:
        # Split channels first; keep HW whole so channel slabs stay contiguous.
        tb, thw = 1, HW
        tc = max((max_elems // HW // sub) * sub, sub)
    else:
        # Last resort: split HW too.
        tb = 1
        tc = C if C < sub else sub
        thw = max((max_elems // tc // 128) * 128, 128)
        if thw >= HW:
            thw = HW

    cost = pl.CostEstimate(
        flops=x.size,
        transcendentals=0,
        bytes_accessed=x.size * x_item + x.size * out_item + b_col.size * b_item,
    )
    alias = {0: 0} if (donate and jnp.dtype(x.dtype) == jnp.dtype(out_dtype)) else {}

    # Channel axis OUTERMOST: the (tc, 1) bias block only changes there.
    grid = (pl.cdiv(C, tc), pl.cdiv(B, tb), pl.cdiv(HW, thw))
    out3 = pl.pallas_call(
        _addbias4d_kernel,
        out_shape=jax.ShapeDtypeStruct((B, C, HW), out_dtype),
        grid_spec=pltpu.PrefetchScalarGridSpec(
            num_scalar_prefetch=0,
            grid=grid,
            in_specs=[
                pl.BlockSpec((tb, tc, thw), lambda c, b, s: (b, c, s)),
                pl.BlockSpec((tc, 1), lambda c, b, s: (c, 0)),
            ],
            out_specs=pl.BlockSpec((tb, tc, thw), lambda c, b, s: (b, c, s)),
        ),
        compiler_params=pltpu.CompilerParams(
            dimension_semantics=("parallel", "parallel", "parallel")),
        cost_estimate=cost,
        input_output_aliases=alias,
    )(x3, b_col)
    return out3.reshape(B, C, H, W)


def _add_bias_2d_tiny_pallas(x, b_vec, out_dtype, donate=False):
    """force_pallas path for D < 128: reshape to a lane-dense slab if possible."""
    B, D = x.shape
    L = math.lcm(D, 128)
    if L <= _MAX_TINY_LANE_WIDTH and (B * D) % L == 0 and (B * D) >= L:
        reps = L // D
        x_flat = x.reshape((B * D) // L, L)
        b_row = jnp.tile(b_vec, reps).reshape(1, L)
        out = _add_bias_2d_pallas(x_flat, b_row, out_dtype, donate=donate)
        return out.reshape(B, D)
    # Shape doesn't permit the lane-dense view: fall back to a full-dim block.
    return _add_bias_2d_pallas(x, b_vec.reshape(1, D), out_dtype, donate=donate)


# ----------------------------- public API ----------------------------------- #

def add_bias(x, bias_param, *, force_pallas=False, donate_x=False):
    """Pallas equivalent of AddBias.forward.

    bias_param: shape (D, 1) — matches nn.Parameter(bias.unsqueeze(1)) — or (D,).
    x: (B, D) or NCHW (B, C, H, W) with C == D.
    donate_x: if True and dtypes allow it, alias x's HBM buffer to the output.
    """
    b_vec = bias_param.reshape(-1)
    d = b_vec.shape[0]

    # PyTorch type promotion for `x + bias` (e.g. bf16 x + f32 bias -> f32).
    # The cast itself happens inside the kernel — x stays at its native dtype.
    out_dtype = jnp.result_type(x.dtype, b_vec.dtype)

    if x.ndim == 2:
        assert x.shape[1] == d, "feature dim must match bias length"
        if x.shape[1] < _MIN_LANES:
            if not force_pallas:
                # Tiny-D regime (typical RL policy-head bias): let XLA fuse the add.
                return x + b_vec[None, :]
            return _add_bias_2d_tiny_pallas(x, b_vec, out_dtype, donate=donate_x)
        return _add_bias_2d_pallas(x, b_vec.reshape(1, d), out_dtype, donate=donate_x)

    elif x.ndim == 4:
        assert x.shape[1] == d, "channel dim must match bias length"
        if x.shape[2] * x.shape[3] < _MIN_LANES and not force_pallas:
            # Tiny feature maps: lane-starved in the kernel; let XLA fuse.
            return x + b_vec[None, :, None, None]
        return _add_bias_4d_pallas(x, b_vec.reshape(d, 1), out_dtype, donate=donate_x)

    else:
        raise ValueError("AddBias expects a 2D or 4D input")


# ----------------------------- demo / check --------------------------------- #

if __name__ == "__main__":
    key = jax.random.PRNGKey(0)
    k_b, k_x2, k_x2w, k_b2, k_x2b, k_xmix, k_b4, k_x4 = jax.random.split(key, 8)

    # --- 2D, tiny policy-head style (hidden=32, batch=2): XLA fallback +
    #     forced-Pallas full-dim tiny block (shape too small for lane-dense view).
    D = 32
    bias_vec = jax.random.normal(k_b, (D,), dtype=jnp.float32)
    bias_param = bias_vec[:, None]                        # (D, 1), like the nn.Parameter
    x2 = jax.random.normal(k_x2, (2, D), dtype=jnp.float32)
    ref2 = x2 + bias_vec[None, :]
    y2_fast = jax.block_until_ready(add_bias(x2, bias_param))
    y2_pal = jax.block_until_ready(add_bias(x2, bias_param, force_pallas=True))
    assert jnp.allclose(y2_fast, ref2, atol=1e-6), "2D (fallback) mismatch"
    assert jnp.allclose(y2_pal, ref2, atol=1e-6), "2D (tiny pallas) mismatch"

    # --- 2D, tiny D but batch=64: exercises the lane-dense reshape path
    #     ((64*32) reshaped to (16, 128) with a tiled bias).
    x2w = jax.random.normal(k_x2w, (64, D), dtype=jnp.float32)
    y2w = jax.block_until_ready(add_bias(x2w, bias_param, force_pallas=True))
    assert jnp.allclose(y2w, x2w + bias_vec[None, :], atol=1e-6), "2D (lane-dense) mismatch"

    # --- 2D, lane-dense (D=256, batch=8): full-feature-dim Pallas block.
    D2 = 256
    bias_vec2 = jax.random.normal(k_b2, (D2,), dtype=jnp.float32)
    x2b = jax.random.normal(k_x2b, (8, D2), dtype=jnp.float32)
    y2b = jax.block_until_ready(add_bias(x2b, bias_vec2[:, None]))
    assert jnp.allclose(y2b, x2b + bias_vec2[None, :], atol=1e-6), "2D (tiled) mismatch"

    # --- 2D, mixed dtype (bf16 x + f32 bias): promotion happens in-kernel.
    xmix = jax.random.normal(k_xmix, (8, D2), dtype=jnp.float32).astype(jnp.bfloat16)
    ymix = jax.block_until_ready(add_bias(xmix, bias_vec2[:, None]))
    refmix = xmix.astype(jnp.float32) + bias_vec2[None, :]
    assert ymix.dtype == jnp.float32, "mixed-dtype promotion dtype mismatch"
    assert jnp.allclose(ymix, refmix, atol=1e-6), "2D (mixed dtype) mismatch"

    # --- 4D NCHW (batch=2, channels=4, spatial=16x16): batch folded into the
    #     block -> single contiguous (2, 4, 256) DMA, one grid step.
    C, H, W = 4, 16, 16
    bias_vec4 = jax.random.normal(k_b4, (C,), dtype=jnp.float32)
    x4 = jax.random.normal(k_x4, (2, C, H, W), dtype=jnp.float32)
    y4 = jax.block_until_ready(add_bias(x4, bias_vec4[:, None]))
    assert jnp.allclose(y4, x4 + bias_vec4[None, :, None, None], atol=1e-6), "4D mismatch"

    print("KERNEL_OK")
</pallas_src>

<mosaic_0001>
module attributes {stable_mosaic.version = 11 : i64} {
  func.func @_addbias2d_kernel(%arg0: i32, %arg1: memref<2x32xf32, #tpu.memory_space<vmem>>, %arg2: memref<1x32xf32, #tpu.memory_space<vmem>>, %arg3: memref<2x32xf32, #tpu.memory_space<vmem>>) attributes {dimension_semantics = [#tpu.dimension_semantics<parallel>], iteration_bounds = array<i64: 1>, scalar_prefetch = 0 : i64, scratch_operands = 0 : i64, tpu.core_type = #tpu.core_type<tc>, window_params = [{transform_indices = @transform_0, window_bounds = array<i64: 2, 32>}, {pipeline_mode = #tpu.pipeline_mode<synchronous>, transform_indices = @transform_1, window_bounds = array<i64: 1, 32>}, {transform_indices = @transform_2, window_bounds = array<i64: 2, 32>}]} {
    %c0 = arith.constant 0 : index
    %c0_0 = arith.constant 0 : index
    %0 = vector.load %arg1[%c0, %c0_0] : memref<2x32xf32, #tpu.memory_space<vmem>>, vector<2x32xf32>
    %c0_1 = arith.constant 0 : index
    %c0_2 = arith.constant 0 : index
    %1 = vector.load %arg2[%c0_1, %c0_2] : memref<1x32xf32, #tpu.memory_space<vmem>>, vector<1x32xf32>
    %2 = vector.broadcast %1 : vector<1x32xf32> to vector<2x32xf32>
    %3 = arith.addf %0, %2 : vector<2x32xf32>
    %c0_3 = arith.constant 0 : index
    %c0_4 = arith.constant 0 : index
    %4 = vector.load %arg3[%c0_3, %c0_4] : memref<2x32xf32, #tpu.memory_space<vmem>>, vector<2x32xf32>
    tpu.vector_store %arg3[%c0_3, %c0_4], %3 {strides = array<i32>} : memref<2x32xf32, #tpu.memory_space<vmem>>, vector<2x32xf32>,
    return
  }
  func.func @transform_0(%arg0: i32) -> (i32, i32) {
    %c0_i32 = arith.constant 0 : i32
    %c0_i32_0 = arith.constant 0 : i32
    return %arg0, %c0_i32 : i32, i32
  }
  func.func @transform_1(%arg0: i32) -> (i32, i32) {
    %c0_i32 = arith.constant 0 : i32
    %c0_i32_0 = arith.constant 0 : i32
    %c0_i32_1 = arith.constant 0 : i32
    return %c0_i32, %c0_i32_0 : i32, i32
  }
  func.func @transform_2(%arg0: i32) -> (i32, i32) {
    %c0_i32 = arith.constant 0 : i32
    %c0_i32_0 = arith.constant 0 : i32
    return %arg0, %c0_i32 : i32, i32
  }
}

</mosaic_0001>

<bundles_post_ra>
// kernel: tpu_custom_call.1
= control target key start
LH: loop header
LB: loop body
LE: loop exit
PB: predicated region body
PF: predicated region fallthrough
CT: control target
= control target key end

     0   :  { %7 = vsyncpa [#allocation3], 0  ;;  %s123_s0 = inlined_call_operand.hbm [shape: f32[2,32], index: 0, kind: input, shape index: {}]   ;;  %s124_s1 = inlined_call_operand.vmem [shape: f32[1,32], index: 1, kind: input, shape index: {}]   ;;  %s125_s2 = inlined_call_operand.hbm [shape: f32[2,32], index: 2, kind: output, shape index: {}]  }
   0x1   :  { %8 = vsyncpa [#allocation4], 0  ;;  %s97_s9 = smov [#allocation2]  }
   0x2   :  { %s15_s10 = sshll.u32 %s97_s9, 4  ;;  %s16_s10 = int_to_ptr.vmem [resolvable:$true] %s15_s10 }
   0x3   :  { %s61_s11 = scalar_lea.vmem %s16_s10, 32  ;;  %p66_p1 = scmp.lt.s32.totalorder %s16_s10, %s16_s10 }
   0x4   :  { %p62_p0 = scmp.ne.s32.totalorder %s16_s10, %s61_s11  ;;  %p67_p2 = scmp.lt.s32.totalorder %s61_s11, %s61_s11 }
   0x6   :  { %p68_p3 = por %p67_p2, %p66_p1 }
   0x8   :  { %p69_p4 = pnand %p68_p3, %p62_p0 }
   0xa   :  { %72 = shalt.err (!%p69_p4)
}
   0xb   :  { %18 = dma.hbm_to_vmem [thread:$0]  %s123_s0, 32, %s16_s10, [#allocation3]  }
   0xc   :  { %93 = dma.done.wait [#allocation3], 32  }
   0xd   :  { %94 = vsyncadd [#allocation3], 4294967264  ;;  %s98_s14 = smov [#allocation5]   ;;  %v24_v0 = vld [vmem:[#allocation2] sm:$0x3]  ;;  %vm33_vm0 = vcmask 254976  }
   0xe   :  { %s41_s15 = sshll.u32 %s98_s14, 4  ;;  %v50_v1 = vld [vmem:[%s124_s1] ss:$0 sm:$0xff]  ;;  %s42_s15 = int_to_ptr.vmem [resolvable:$true] %s41_s15 }
   0xf   :  { %v32_v2 = vadd.f32 %v50_v1, %v24_v0  ;;  %s73_s18 = scalar_lea.vmem %s42_s15, 32  ;;  %p78_p6 = scmp.lt.s32.totalorder %s42_s15, %s42_s15 }
  0x10   :  { %p74_p5 = scmp.ne.s32.totalorder %s42_s15, %s73_s18  ;;  %p79_p7 = scmp.lt.s32.totalorder %s73_s18, %s73_s18 }
  0x11   :  { %34 = vst.msk [vmem:[#allocation5] sm:$0x3] %vm33_vm0, %v32_v2 }
  0x12   :  { %p80_p8 = por %p79_p7, %p78_p6 }
  0x14   :  { %p81_p9 = pnand %p80_p8, %p74_p5 }
  0x16   :  { %84 = shalt.err (!%p81_p9)
}
  0x17   :  { %44 = dma.vmem_to_hbm [thread:$0]  %s42_s15, 32, %s125_s2, [#allocation4]  }
  0x18   :  { %95 = dma.done.wait [#allocation4], 32  }
  0x19   :  { %96 = vsyncadd [#allocation4], 4294967264 }
  0x1a   :  { %48 = vsyncpa [#allocation3], 1 }
  0x1b   :  { %49 = vsyncpa [#allocation4], 1 }

</bundles_post_ra>
